<compile_context>
chip_gen: v7x
topology: tpu7x:2x2x1
jax: 0.10.0
libtpu: 0.0.40
codegen_flags: <defaults>
</compile_context>

<pallas_src>
import functools

import jax
import jax.numpy as jnp
from jax.experimental import pallas as pl
from jax.experimental.pallas import tpu as pltpu


def _round_up(x, m):
    return (x + m - 1) // m * m


def _basic_block_kernel(xt_ref, xh_ref, w1_ref, b1_ref, w2_ref, b2_ref, o_ref,
                        *, TL, L, H, K1, K2, P2):
    """One (batch, L-tile) per grid step.

    xt_ref : (1, TL, Cp)     bf16  x tile (also the residual)
    xh_ref : (1, 2H, Cp)     bf16  [left halo rows ; right halo rows]
    w1_ref : (K1, Cp, Cp)    bf16  conv1 weights per tap, BN1 scale folded in
    b1_ref : (1, Cp)         f32   BN1 bias
    w2_ref : (K2, Cp, Cp)    bf16  conv2 weights per tap, BN2 scale folded in
    b2_ref : (1, Cp)         f32   BN2 bias
    o_ref  : (1, TL, Cp)     bf16  output tile
    """
    i = pl.program_id(1)
    M1 = TL + 2 * P2                       # conv1 rows needed by conv2
    cp = xt_ref.shape[-1]

    xt = xt_ref[0]                         # (TL, Cp) bf16 — residual + conv1 input
    xh = xh_ref[0]                         # (2H, Cp) bf16
    # Extended input rows [-H, TL+H) for this tile (halo rows are zero at the
    # array edges == conv1 "same" zero padding).
    xe = jnp.concatenate([xh[:H, :], xt, xh[H:, :]], axis=0)   # (TL+2H, Cp)

    # ---- conv1 (+BN1 scale folded into w1): K1 accumulating tap matmuls ----
    h = jnp.zeros((M1, cp), jnp.float32)
    for k in range(K1):                    # static unroll; f32 MXU accumulation
        h = h + jnp.dot(xe[k:k + M1, :], w1_ref[k],
                        preferred_element_type=jnp.float32)
    h = jnp.maximum(h + b1_ref[...], 0.0)

    # Rows of h outside the global range [0, L) are conv2's "same" zero padding
    # of the post-relu feature map -> force them to zero (this also zeroes the
    # relu(b1) rows produced by the wrapper's length padding).
    g = i * TL + jax.lax.broadcasted_iota(jnp.int32, (M1, 1), 0) - P2
    h = jnp.where((g >= 0) & (g < L), h, 0.0)

    # ---- conv2 (+BN2 scale folded into w2): K2 accumulating tap matmuls ----
    hb = h.astype(xt.dtype)
    out = jnp.zeros((TL, cp), jnp.float32)
    for k in range(K2):
        out = out + jnp.dot(hb[k:k + TL, :], w2_ref[k],
                            preferred_element_type=jnp.float32)

    # ---- bias + residual add + ReLU in f32; cast only at the store ----
    out = out + b2_ref[...] + xt.astype(jnp.float32)
    o_ref[0] = jnp.maximum(out, 0.0).astype(o_ref.dtype)


def _fold_params(params, cout, cpad, k1, k2, eps=1e-5):
    """Fold eval-mode BatchNorm scale into the conv weights; keep bias separate."""
    (w1, g1, be1, m1, v1, w2, g2, be2, m2, v2) = params
    inv1 = g1 / jnp.sqrt(v1 + eps)
    inv2 = g2 / jnp.sqrt(v2 + eps)
    b1 = be1 - m1 * inv1
    b2 = be2 - m2 * inv2

    def tap_weights(w, scale):
        # (Cout, Cin, K) -> (K, Cin, Cout), BN scale folded in, lane-padded.
        wt = jnp.transpose(w, (2, 1, 0)) * scale[None, None, :]
        wt = jnp.pad(wt, ((0, 0), (0, cpad - w.shape[1]), (0, cpad - w.shape[0])))
        return wt.astype(jnp.bfloat16)

    w1_f = tap_weights(w1, inv1)
    w2_f = tap_weights(w2, inv2)
    b1_f = jnp.pad(b1, (0, cpad - cout)).reshape(1, cpad).astype(jnp.float32)
    b2_f = jnp.pad(b2, (0, cpad - cout)).reshape(1, cpad).astype(jnp.float32)
    return w1_f, b1_f, w2_f, b2_f


def basic_block1d_nlc(x_nlc, folded, *, kernel_size=(3, 3), l_tile=512,
                      vmem_limit_bytes=64 * 1024 * 1024):
    """Fused BasicBlock1d on channels-last, lane-padded bf16 activations.

    x_nlc: (N, L, Cp) bf16 with Cp a multiple of 128 (padded channels zero).
    Returns (N, L, Cp) bf16 in the same layout so stacked blocks can chain
    without any NCL<->NLC transposes or un-padding in between.
    """
    w1_f, b1_f, w2_f, b2_f = folded
    n, L, cpad = x_nlc.shape
    assert cpad % 128 == 0, "channels must be lane-padded to a multiple of 128"
    k1, k2 = kernel_size
    assert k1 % 2 == 1 and k2 % 2 == 1, "even kernel sizes change the output length"
    p1, p2 = (k1 - 1) // 2, (k2 - 1) // 2
    halo = p1 + p2
    assert halo >= 1, "kernel_size=(1,1) not supported"

    # L tile: multiple of 16 (bf16 sublane packing).  No whole-L fallback —
    # the length is zero-padded to a multiple of the tile instead, so the
    # per-step working set stays O(tl*cpad) regardless of L.
    tl = min(l_tile, _round_up(L, 16))
    tl = max(16, (tl // 16) * 16)
    assert halo <= tl
    Lp = _round_up(L, tl)
    t = Lp // tl

    xp = x_nlc
    if Lp != L:
        xp = jnp.pad(xp, ((0, 0), (0, Lp - L), (0, 0)))

    # ---- tiny per-tile halo array (2*halo bf16 rows per (batch, tile)),
    #      built with a single vectorized gather ----
    xe_full = jnp.pad(xp, ((0, 0), (halo, halo), (0, 0)))        # zero edges
    j = jnp.arange(2 * halo)
    idx = (jnp.arange(t)[:, None] * tl
           + jnp.where(j < halo, j, tl + j)[None, :]).reshape(-1)
    halo_arr = jnp.take(xe_full, idx, axis=1).reshape(n * t, 2 * halo, cpad)

    kern = functools.partial(_basic_block_kernel, TL=tl, L=L, H=halo,
                             K1=k1, K2=k2, P2=p2)

    out = pl.pallas_call(
        kern,
        out_shape=jax.ShapeDtypeStruct((n, Lp, cpad), jnp.bfloat16),
        grid_spec=pltpu.PrefetchScalarGridSpec(
            num_scalar_prefetch=0,
            grid=(n, t),
            in_specs=[
                pl.BlockSpec((1, tl, cpad), lambda b, i: (b, i, 0)),
                pl.BlockSpec((1, 2 * halo, cpad), lambda b, i: (b * t + i, 0, 0)),
                # NOTE: these four operands are grid-constant; for very wide
                # channels (cpad >= 512) single-buffer them (pl.Buffered(1) /
                # load-once-to-scratch) to save VMEM on v7x.  At cpad=128 the
                # default double buffering costs < 0.2 MiB, so keep it simple.
                pl.BlockSpec((k1, cpad, cpad), lambda b, i: (0, 0, 0)),
                pl.BlockSpec((1, cpad), lambda b, i: (0, 0)),
                pl.BlockSpec((k2, cpad, cpad), lambda b, i: (0, 0, 0)),
                pl.BlockSpec((1, cpad), lambda b, i: (0, 0)),
            ],
            out_specs=pl.BlockSpec((1, tl, cpad), lambda b, i: (b, i, 0)),
        ),
        compiler_params=pltpu.CompilerParams(
            dimension_semantics=("parallel", "parallel"),
            vmem_limit_bytes=vmem_limit_bytes),
    )(xp, halo_arr, w1_f, b1_f, w2_f, b2_f)

    return out[:, :L, :] if Lp != L else out


def basic_block1d_forward(x_ncl, params, *, kernel_size=(3, 3), l_tile=512,
                          vmem_limit_bytes=64 * 1024 * 1024):
    """PyTorch-layout wrapper: (N, Cin, L) f32 -> (N, Cout, L) f32.

    Layout conversion / un-padding happens only here, at the model boundary;
    stacked blocks should call `basic_block1d_nlc` directly on the bf16
    channels-last activations to avoid extra HBM passes per block.
    """
    n, cin, L = x_ncl.shape
    cout = params[0].shape[0]
    assert cin == cout, "downsample=None requires inplanes == planes"
    k1, k2 = kernel_size
    cpad = _round_up(cout, 128)

    folded = _fold_params(params, cout, cpad, k1, k2)

    x_nlc = jnp.transpose(x_ncl, (0, 2, 1))
    xp = jnp.pad(x_nlc, ((0, 0), (0, 0), (0, cpad - cin))).astype(jnp.bfloat16)

    out = basic_block1d_nlc(xp, folded, kernel_size=kernel_size, l_tile=l_tile,
                            vmem_limit_bytes=vmem_limit_bytes)
    return jnp.transpose(out[:, :, :cout].astype(jnp.float32), (0, 2, 1))


def _reference_forward(x, params, *, kernel_size=(3, 3)):
    """Pure-JAX f32 reference (PyTorch module in eval mode)."""
    (w1, g1, be1, m1, v1, w2, g2, be2, m2, v2) = params
    eps = 1e-5
    k1, k2 = kernel_size
    p1, p2 = (k1 - 1) // 2, (k2 - 1) // 2

    def conv1d(x, w, pad):
        return jax.lax.conv_general_dilated(
            x, w, window_strides=(1,), padding=[(pad, pad)],
            dimension_numbers=("NCH", "OIH", "NCH"))

    def bn(x, g, b, m, v):
        g, b, m, v = (t.reshape(1, -1, 1) for t in (g, b, m, v))
        return (x - m) / jnp.sqrt(v + eps) * g + b

    residual = x
    out = jnp.maximum(bn(conv1d(x, w1, p1), g1, be1, m1, v1), 0.0)
    out = bn(conv1d(out, w2, p2), g2, be2, m2, v2)
    return jnp.maximum(out + residual, 0.0)


def _init_params(key, inplanes, planes, k1, k2):
    ks = jax.random.split(key, 6)
    w1 = jax.random.normal(ks[0], (planes, inplanes, k1), jnp.float32) * 0.1
    w2 = jax.random.normal(ks[1], (planes, planes, k2), jnp.float32) * 0.1
    g1 = 1.0 + 0.1 * jax.random.normal(ks[2], (planes,), jnp.float32)
    be1 = 0.1 * jax.random.normal(ks[3], (planes,), jnp.float32)
    m1 = 0.05 * jax.random.normal(ks[4], (planes,), jnp.float32)
    v1 = 1.0 + 0.1 * jax.random.uniform(ks[5], (planes,), jnp.float32)
    g2 = jnp.ones((planes,), jnp.float32) * 0.9
    be2 = jnp.full((planes,), 0.05, jnp.float32)
    m2 = jnp.full((planes,), -0.02, jnp.float32)
    v2 = jnp.full((planes,), 1.2, jnp.float32)
    return (w1, g1, be1, m1, v1, w2, g2, be2, m2, v2)


if __name__ == "__main__":
    key = jax.random.PRNGKey(0)
    k_x, k_p = jax.random.split(key)

    N, C, L = 2, 8, 32          # batch, channels (inplanes == planes), length
    K1, K2 = 3, 3               # default kernel_size=[3, 3]

    x = jax.random.normal(k_x, (N, C, L), jnp.float32)
    params = _init_params(k_p, C, C, K1, K2)

    # l_tile=16 -> 2 L-tiles per batch element, exercising the halo path.
    out = basic_block1d_forward(x, params, kernel_size=(K1, K2), l_tile=16)
    out = jax.block_until_ready(out)

    # Reference sees the same bf16-rounded activations the kernel streams; the
    # remaining delta is bf16 weight/matmul rounding plus the bf16 output cast.
    x_bf = x.astype(jnp.bfloat16).astype(jnp.float32)
    ref = _reference_forward(x_bf, params, kernel_size=(K1, K2))
    assert out.shape == (N, C, L)
    assert jnp.allclose(out, ref, atol=4e-2, rtol=4e-2), "mismatch vs reference"

    print("KERNEL_OK")
</pallas_src>

<mosaic_0001>
module attributes {stable_mosaic.version = 11 : i64} {
  func.func @_basic_block_kernel(%arg0: i32, %arg1: i32, %arg2: memref<1x16x128xbf16, #tpu.memory_space<vmem>>, %arg3: memref<1x4x128xbf16, #tpu.memory_space<vmem>>, %arg4: memref<3x128x128xbf16, #tpu.memory_space<vmem>>, %arg5: memref<1x128xf32, #tpu.memory_space<vmem>>, %arg6: memref<3x128x128xbf16, #tpu.memory_space<vmem>>, %arg7: memref<1x128xf32, #tpu.memory_space<vmem>>, %arg8: memref<1x16x128xbf16, #tpu.memory_space<vmem>>) attributes {dimension_semantics = [#tpu.dimension_semantics<parallel>, #tpu.dimension_semantics<parallel>], iteration_bounds = array<i64: 2, 2>, scalar_prefetch = 0 : i64, scratch_operands = 0 : i64, tpu.core_type = #tpu.core_type<tc>, window_params = [{transform_indices = @transform_0, window_bounds = array<i64: 1, 16, 128>}, {transform_indices = @transform_1, window_bounds = array<i64: 1, 4, 128>}, {pipeline_mode = #tpu.pipeline_mode<synchronous>, transform_indices = @transform_2, window_bounds = array<i64: 3, 128, 128>}, {pipeline_mode = #tpu.pipeline_mode<synchronous>, transform_indices = @transform_3, window_bounds = array<i64: 1, 128>}, {pipeline_mode = #tpu.pipeline_mode<synchronous>, transform_indices = @transform_4, window_bounds = array<i64: 3, 128, 128>}, {pipeline_mode = #tpu.pipeline_mode<synchronous>, transform_indices = @transform_5, window_bounds = array<i64: 1, 128>}, {transform_indices = @transform_6, window_bounds = array<i64: 1, 16, 128>}]} {
    %c0 = arith.constant 0 : index
    %c0_0 = arith.constant 0 : index
    %c0_1 = arith.constant 0 : index
    %0 = vector.load %arg2[%c0, %c0_0, %c0_1] : memref<1x16x128xbf16, #tpu.memory_space<vmem>>, vector<1x16x128xbf16>
    %1 = vector.shape_cast %0 : vector<1x16x128xbf16> to vector<16x128xbf16>
    %c0_2 = arith.constant 0 : index
    %c0_3 = arith.constant 0 : index
    %c0_4 = arith.constant 0 : index
    %2 = vector.load %arg3[%c0_2, %c0_3, %c0_4] : memref<1x4x128xbf16, #tpu.memory_space<vmem>>, vector<1x4x128xbf16>
    %3 = vector.shape_cast %2 : vector<1x4x128xbf16> to vector<4x128xbf16>
    %4 = vector.extract_strided_slice %3 {offsets = [0, 0], sizes = [2, 128], strides = [1, 1]} : vector<4x128xbf16> to vector<2x128xbf16>
    %5 = vector.extract_strided_slice %3 {offsets = [2, 0], sizes = [2, 128], strides = [1, 1]} : vector<4x128xbf16> to vector<2x128xbf16>
    %6 = tpu.concatenate %4, %1, %5 in 0 : vector<2x128xbf16>, vector<16x128xbf16>, vector<2x128xbf16> -> vector<20x128xbf16>
    %cst = arith.constant 0.000000e+00 : f32
    %7 = vector.broadcast %cst : f32 to vector<18x128xf32>
    %8 = vector.extract_strided_slice %6 {offsets = [0, 0], sizes = [18, 128], strides = [1, 1]} : vector<20x128xbf16> to vector<18x128xbf16>
    %c0_5 = arith.constant 0 : index
    %c0_6 = arith.constant 0 : index
    %c0_7 = arith.constant 0 : index
    %9 = vector.load %arg4[%c0_5, %c0_6, %c0_7] : memref<3x128x128xbf16, #tpu.memory_space<vmem>>, vector<1x128x128xbf16>
    %10 = vector.shape_cast %9 : vector<1x128x128xbf16> to vector<128x128xbf16>
    %cst_8 = arith.constant dense<0.000000e+00> : vector<18x128xf32>
    %11 = tpu.matmul %8, %10, %cst_8 {dimension_numbers = #tpu.dot_dimension_numbers<[1], [0], [0], [1], [0, 0, 1, 1], [], []>} : vector<18x128xbf16>, vector<128x128xbf16>, vector<18x128xf32> -> vector<18x128xf32>
    %12 = arith.addf %7, %11 : vector<18x128xf32>
    %13 = vector.extract_strided_slice %6 {offsets = [1, 0], sizes = [18, 128], strides = [1, 1]} : vector<20x128xbf16> to vector<18x128xbf16>
    %c1 = arith.constant 1 : index
    %c0_9 = arith.constant 0 : index
    %c0_10 = arith.constant 0 : index
    %14 = vector.load %arg4[%c1, %c0_9, %c0_10] : memref<3x128x128xbf16, #tpu.memory_space<vmem>>, vector<1x128x128xbf16>
    %15 = vector.shape_cast %14 : vector<1x128x128xbf16> to vector<128x128xbf16>
    %cst_11 = arith.constant dense<0.000000e+00> : vector<18x128xf32>
    %16 = tpu.matmul %13, %15, %cst_11 {dimension_numbers = #tpu.dot_dimension_numbers<[1], [0], [0], [1], [0, 0, 1, 1], [], []>} : vector<18x128xbf16>, vector<128x128xbf16>, vector<18x128xf32> -> vector<18x128xf32>
    %17 = arith.addf %12, %16 : vector<18x128xf32>
    %18 = vector.extract_strided_slice %6 {offsets = [2, 0], sizes = [18, 128], strides = [1, 1]} : vector<20x128xbf16> to vector<18x128xbf16>
    %c2 = arith.constant 2 : index
    %c0_12 = arith.constant 0 : index
    %c0_13 = arith.constant 0 : index
    %19 = vector.load %arg4[%c2, %c0_12, %c0_13] : memref<3x128x128xbf16, #tpu.memory_space<vmem>>, vector<1x128x128xbf16>
    %20 = vector.shape_cast %19 : vector<1x128x128xbf16> to vector<128x128xbf16>
    %cst_14 = arith.constant dense<0.000000e+00> : vector<18x128xf32>
    %21 = tpu.matmul %18, %20, %cst_14 {dimension_numbers = #tpu.dot_dimension_numbers<[1], [0], [0], [1], [0, 0, 1, 1], [], []>} : vector<18x128xbf16>, vector<128x128xbf16>, vector<18x128xf32> -> vector<18x128xf32>
    %22 = arith.addf %17, %21 : vector<18x128xf32>
    %c0_15 = arith.constant 0 : index
    %c0_16 = arith.constant 0 : index
    %23 = vector.load %arg5[%c0_15, %c0_16] : memref<1x128xf32, #tpu.memory_space<vmem>>, vector<1x128xf32>
    %24 = vector.broadcast %23 : vector<1x128xf32> to vector<18x128xf32>
    %25 = arith.addf %22, %24 : vector<18x128xf32>
    %cst_17 = arith.constant 0.000000e+00 : f32
    %26 = vector.broadcast %cst_17 : f32 to vector<18x128xf32>
    %27 = arith.maximumf %25, %26 : vector<18x128xf32>
    %c16_i32 = arith.constant 16 : i32
    %28 = arith.muli %arg1, %c16_i32 : i32
    %29 = tpu.iota {dimensions = array<i32: 0>} : vector<18x1xi32>
    %30 = vector.broadcast %28 : i32 to vector<18x1xi32>
    %31 = arith.addi %30, %29 : vector<18x1xi32>
    %c1_i32 = arith.constant 1 : i32
    %32 = vector.broadcast %c1_i32 : i32 to vector<18x1xi32>
    %33 = arith.subi %31, %32 : vector<18x1xi32>
    %c0_i32 = arith.constant 0 : i32
    %34 = vector.broadcast %c0_i32 : i32 to vector<18x1xi32>
    %35 = arith.cmpi sge, %33, %34 : vector<18x1xi32>
    %c32_i32 = arith.constant 32 : i32
    %36 = vector.broadcast %c32_i32 : i32 to vector<18x1xi32>
    %37 = arith.cmpi slt, %33, %36 : vector<18x1xi32>
    %38 = arith.andi %35, %37 : vector<18x1xi1>
    %cst_18 = arith.constant 0.000000e+00 : f32
    %39 = vector.shape_cast %38 : vector<18x1xi1> to vector<18x1xi1>
    %40 = vector.broadcast %39 : vector<18x1xi1> to vector<18x128xi1>
    %41 = vector.broadcast %cst_18 : f32 to vector<18x128xf32>
    %42 = arith.select %40, %27, %41 : vector<18x128xi1>, vector<18x128xf32>
    %43 = arith.truncf %42 : vector<18x128xf32> to vector<18x128xbf16>
    %cst_19 = arith.constant 0.000000e+00 : f32
    %44 = vector.broadcast %cst_19 : f32 to vector<16x128xf32>
    %45 = vector.extract_strided_slice %43 {offsets = [0, 0], sizes = [16, 128], strides = [1, 1]} : vector<18x128xbf16> to vector<16x128xbf16>
    %c0_20 = arith.constant 0 : index
    %c0_21 = arith.constant 0 : index
    %c0_22 = arith.constant 0 : index
    %46 = vector.load %arg6[%c0_20, %c0_21, %c0_22] : memref<3x128x128xbf16, #tpu.memory_space<vmem>>, vector<1x128x128xbf16>
    %47 = vector.shape_cast %46 : vector<1x128x128xbf16> to vector<128x128xbf16>
    %cst_23 = arith.constant dense<0.000000e+00> : vector<16x128xf32>
    %48 = tpu.matmul %45, %47, %cst_23 {dimension_numbers = #tpu.dot_dimension_numbers<[1], [0], [0], [1], [0, 0, 1, 1], [], []>} : vector<16x128xbf16>, vector<128x128xbf16>, vector<16x128xf32> -> vector<16x128xf32>
    %49 = arith.addf %44, %48 : vector<16x128xf32>
    %50 = vector.extract_strided_slice %43 {offsets = [1, 0], sizes = [16, 128], strides = [1, 1]} : vector<18x128xbf16> to vector<16x128xbf16>
    %c1_24 = arith.constant 1 : index
    %c0_25 = arith.constant 0 : index
    %c0_26 = arith.constant 0 : index
    %51 = vector.load %arg6[%c1_24, %c0_25, %c0_26] : memref<3x128x128xbf16, #tpu.memory_space<vmem>>, vector<1x128x128xbf16>
    %52 = vector.shape_cast %51 : vector<1x128x128xbf16> to vector<128x128xbf16>
    %cst_27 = arith.constant dense<0.000000e+00> : vector<16x128xf32>
    %53 = tpu.matmul %50, %52, %cst_27 {dimension_numbers = #tpu.dot_dimension_numbers<[1], [0], [0], [1], [0, 0, 1, 1], [], []>} : vector<16x128xbf16>, vector<128x128xbf16>, vector<16x128xf32> -> vector<16x128xf32>
    %54 = arith.addf %49, %53 : vector<16x128xf32>
    %55 = vector.extract_strided_slice %43 {offsets = [2, 0], sizes = [16, 128], strides = [1, 1]} : vector<18x128xbf16> to vector<16x128xbf16>
    %c2_28 = arith.constant 2 : index
    %c0_29 = arith.constant 0 : index
    %c0_30 = arith.constant 0 : index
    %56 = vector.load %arg6[%c2_28, %c0_29, %c0_30] : memref<3x128x128xbf16, #tpu.memory_space<vmem>>, vector<1x128x128xbf16>
    %57 = vector.shape_cast %56 : vector<1x128x128xbf16> to vector<128x128xbf16>
    %cst_31 = arith.constant dense<0.000000e+00> : vector<16x128xf32>
    %58 = tpu.matmul %55, %57, %cst_31 {dimension_numbers = #tpu.dot_dimension_numbers<[1], [0], [0], [1], [0, 0, 1, 1], [], []>} : vector<16x128xbf16>, vector<128x128xbf16>, vector<16x128xf32> -> vector<16x128xf32>
    %59 = arith.addf %54, %58 : vector<16x128xf32>
    %c0_32 = arith.constant 0 : index
    %c0_33 = arith.constant 0 : index
    %60 = vector.load %arg7[%c0_32, %c0_33] : memref<1x128xf32, #tpu.memory_space<vmem>>, vector<1x128xf32>
    %61 = vector.broadcast %60 : vector<1x128xf32> to vector<16x128xf32>
    %62 = arith.addf %59, %61 : vector<16x128xf32>
    %63 = arith.extf %1 : vector<16x128xbf16> to vector<16x128xf32>
    %64 = arith.addf %62, %63 : vector<16x128xf32>
    %cst_34 = arith.constant 0.000000e+00 : f32
    %65 = vector.broadcast %cst_34 : f32 to vector<16x128xf32>
    %66 = arith.maximumf %64, %65 : vector<16x128xf32>
    %67 = arith.truncf %66 : vector<16x128xf32> to vector<16x128xbf16>
    %c0_35 = arith.constant 0 : index
    %c0_36 = arith.constant 0 : index
    %c0_37 = arith.constant 0 : index
    %68 = vector.load %arg8[%c0_35, %c0_36, %c0_37] : memref<1x16x128xbf16, #tpu.memory_space<vmem>>, vector<1x16x128xbf16>
    %69 = vector.shape_cast %68 : vector<1x16x128xbf16> to vector<16x128xbf16>
    %70 = vector.shape_cast %67 : vector<16x128xbf16> to vector<1x16x128xbf16>
    tpu.vector_store %arg8[%c0_35, %c0_36, %c0_37], %70 {strides = array<i32>} : memref<1x16x128xbf16, #tpu.memory_space<vmem>>, vector<1x16x128xbf16>,
    return
  }
  func.func @transform_0(%arg0: i32, %arg1: i32) -> (i32, i32, i32) {
    %c0_i32 = arith.constant 0 : i32
    %c0_i32_0 = arith.constant 0 : i32
    return %arg0, %arg1, %c0_i32 : i32, i32, i32
  }
  func.func @transform_1(%arg0: i32, %arg1: i32) -> (i32, i32, i32) {
    %c2_i32 = arith.constant 2 : i32
    %0 = arith.muli %arg0, %c2_i32 : i32
    %1 = arith.addi %0, %arg1 : i32
    %c0_i32 = arith.constant 0 : i32
    %c0_i32_0 = arith.constant 0 : i32
    %c0_i32_1 = arith.constant 0 : i32
    return %1, %c0_i32, %c0_i32_0 : i32, i32, i32
  }
  func.func @transform_2(%arg0: i32, %arg1: i32) -> (i32, i32, i32) {
    %c0_i32 = arith.constant 0 : i32
    %c0_i32_0 = arith.constant 0 : i32
    %c0_i32_1 = arith.constant 0 : i32
    %c0_i32_2 = arith.constant 0 : i32
    return %c0_i32, %c0_i32_0, %c0_i32_1 : i32, i32, i32
  }
  func.func @transform_3(%arg0: i32, %arg1: i32) -> (i32, i32) {
    %c0_i32 = arith.constant 0 : i32
    %c0_i32_0 = arith.constant 0 : i32
    %c0_i32_1 = arith.constant 0 : i32
    return %c0_i32, %c0_i32_0 : i32, i32
  }
  func.func @transform_4(%arg0: i32, %arg1: i32) -> (i32, i32, i32) {
    %c0_i32 = arith.constant 0 : i32
    %c0_i32_0 = arith.constant 0 : i32
    %c0_i32_1 = arith.constant 0 : i32
    %c0_i32_2 = arith.constant 0 : i32
    return %c0_i32, %c0_i32_0, %c0_i32_1 : i32, i32, i32
  }
  func.func @transform_5(%arg0: i32, %arg1: i32) -> (i32, i32) {
    %c0_i32 = arith.constant 0 : i32
    %c0_i32_0 = arith.constant 0 : i32
    %c0_i32_1 = arith.constant 0 : i32
    return %c0_i32, %c0_i32_0 : i32, i32
  }
  func.func @transform_6(%arg0: i32, %arg1: i32) -> (i32, i32, i32) {
    %c0_i32 = arith.constant 0 : i32
    %c0_i32_0 = arith.constant 0 : i32
    return %arg0, %arg1, %c0_i32 : i32, i32, i32
  }
}

</mosaic_0001>

<bundles_post_ra>
// kernel: tpu_custom_call.1
= control target key start
LH: loop header
LB: loop body
LE: loop exit
PB: predicated region body
PF: predicated region fallthrough
CT: control target
= control target key end

     0   :  { %s2679_s0 = inlined_call_operand.hbm [shape: bf16[2,32,128], index: 0, kind: input, shape index: {}]   ;;  %s2680_s1 = inlined_call_operand.hbm [shape: bf16[4,4,128], index: 1, kind: input, shape index: {}]   ;;  %s2681_s2 = inlined_call_operand.hbm [shape: bf16[3,128,128], index: 2, kind: input, shape index: {}]   ;;  %s2682_s3 = inlined_call_operand.hbm [shape: f32[1,128], index: 3, kind: input, shape index: {}]   ;;  %s2683_s4 = inlined_call_operand.hbm [shape: bf16[3,128,128], index: 4, kind: input, shape index: {}]   ;;  %s2684_s5 = inlined_call_operand.hbm [shape: f32[1,128], index: 5, kind: input, shape index: {}]   ;;  %s2685_s6 = inlined_call_operand.hbm [shape: bf16[2,32,128], index: 6, kind: output, shape index: {}]  }
   0x1   :  { %2704 = sst [smem:[#allocation28_spill]] %s2679_s0 }
   0x2   :  { %2705 = sst [smem:[#allocation29_spill]] %s2680_s1 }
   0x3   :  { %2706 = sst [smem:[#allocation30_spill]] %s2681_s2 }
   0x4   :  { %2707 = sst [smem:[#allocation31_spill]] %s2682_s3 }
   0x5   :  { %2708 = sst [smem:[#allocation32_spill]] %s2683_s4 }
   0x6   :  { %2709 = sst [smem:[#allocation33_spill]] %s2684_s5 }
   0x7   :  { %2710 = sst [smem:[#allocation34_spill]] %s2685_s6 }
   0x8   :  { %11 = vsyncpa [#allocation3], 0 }
   0x9   :  { %13 = vsyncpa [#allocation3 + $0x1], 0 }
   0xa   :  { %14 = vsyncpa [#allocation6], 0 }
   0xb   :  { %16 = vsyncpa [#allocation6 + $0x1], 0 }
   0xc   :  { %17 = vsyncpa [#allocation9], 0 }
   0xd   :  { %18 = vsyncpa [#allocation12], 0 }
   0xe   :  { %19 = vsyncpa [#allocation4], 0 }
   0xf   :  { %21 = vsyncpa [#allocation4 + $0x1], 0  ;;  %s2187_s21 = smov 0   ;;  %s2189_s22 = smov 0  }
  0x10   :  { %s2191_s23 = smov 0   ;;  %s2193_s24 = smov 0  }
  0x11   :  { %s2195_s25 = smov 0   ;;  %s2197_s26 = smov 0  }
  0x12   :  { %s2199_s27 = smov 0   ;;  %s2201_s28 = smov 0  }
  0x13   :  { %s2203_s29 = smov 0   ;;  %s2205_s30 = smov 0  }
  0x14   :  { %s2207_s7 = smov 0  }
  0x15 LB: > { %2711 = sst [smem:[#allocation20_spill]] %s2101_s22  ;;  %s2243_s8 = sadd.s32 4294967295, %s2137_s7   ;;  %s2137_s7 = sphi %s2207_s7, %s27_s7   ;;  %s2133_s30 = sphi %s2205_s30, %s2773_s30   ;;  %s2129_s29 = sphi %s2203_s29, %s2772_s29   ;;  %s2125_s28 = sphi %s2201_s28, %s2771_s28   ;;  %s2121_s27 = sphi %s2199_s27, %s2765_s27   ;;  %s2117_s26 = sphi %s2197_s26, %s2770_s26   ;;  %s2113_s25 = sphi %s2195_s25, %s2769_s25   ;;  %s2109_s24 = sphi %s2193_s24, %s2768_s24   ;;  %s2105_s23 = sphi %s2191_s23, %s2767_s23   ;;  %s2101_s22 = sphi %s2189_s22, %s2766_s22   ;;  %s2097_s21 = sphi %s2187_s21, %s2764_s21  }
  0x16   : > { %2712 = sst [smem:[#allocation21_spill]] %s2109_s24  ;;  %p1352_p0 = scmp.ge.s32.totalorder %s2137_s7, 1 }
  0x17   : > { %2713 = sst [smem:[#allocation22_spill]] %s2121_s27  ;;  %p2687_p1 = scmp.eq.s32.totalorder %s2243_s8, 0 }
  0x18   : > { %2714 = sst [smem:[#allocation23_spill]] %s2125_s28  ;;  %p214_p3 = scmp.lt.s32.totalorder %s2137_s7, 5 }
  0x19   : > { %2715 = sst [smem:[#allocation24_spill]] %s2129_s29  ;;  %s2139_s10 = smov [#allocation7]  }
  0x1a   : > { %p2249_p4 = pnand %p1352_p0, %p214_p3  ;;  %s226_s11 = sshll.u32 %s2139_s10, 4  ;;  %s2253_s11 = int_to_ptr.vmem [resolvable:$true] %s226_s11 }
  0x1b   : > { %s2140_s13 = smov [#allocation8]   ;;  %s2141_s15 = smov [#allocation10]  }
  0x1c   : > { %s2716_s9 = scalar_select %p2249_p4, 1, 0 }
  0x1d   : > { %p1645_p5 = pneg %p2249_p4  ;;  %s240_s14 = sshll.u32 %s2140_s13, 4  ;;  %s2263_s14 = int_to_ptr.vmem [resolvable:$true] %s240_s14 }
  0x1e   : > { %2717 = sst [smem:[#allocation25_spill]] %s2716_s9  ;;  %s250_s16 = sshll.u32 %s2141_s15, 4  ;;  %s2265_s16 = int_to_ptr.vmem [resolvable:$true] %s250_s16 }
  0x1f   : > { %p2259_p6 = pnand %p1645_p5, %p2687_p1  ;;  %s2719_s2 = sld [smem:[#allocation30_spill]] }
  0x21   : > { %p2275_p8 = pneg %p2259_p6 }
  0x25   : > { %s1827_s19 = scalar_lea.hbm %s2719_s2, 3072 }
  0x26   : > { %p1828_p7 = scmp.ne.s32.totalorder %s2719_s2, %s1827_s19  ;;  %p1834_p11 = scmp.lt.u32.totalorder %s1827_s19, %s2719_s2 }
  0x28   : > { %p1830_p9 = pnand %p2275_p8, %p1828_p7 }
  0x2a   : > { %p1831_p10 = pneg %p1830_p9 }
  0x2c   : > { %p1836_p12 = pnand %p1834_p11, %p1831_p10 }
  0x2e   : > { %1839 = shalt.err (!%p1836_p12)
}
  0x2f   : > { %s1840_s17 = scalar_lea.vmem %s2253_s11, 3072  ;;  %p1848_p5 = scmp.lt.s32.totalorder %s2253_s11, %s2253_s11 }
  0x30   : > { %p1841_p13 = scmp.ne.s32.totalorder %s2253_s11, %s1840_s17  ;;  %p1849_p1 = scmp.lt.s32.totalorder %s1840_s17, %s1840_s17 }
  0x32   : > { %p1843_p0 = pnand %p1841_p13, %p2275_p8  ;;  %p1850_p7 = por %p1849_p1, %p1848_p5 }
  0x34   : > { %p1844_p3 = pneg %p1843_p0 }
  0x36   : > { %p1851_p9 = pnand %p1850_p7, %p1844_p3 }
  0x38   : > { %1854 = shalt.err (!%p1851_p9)
}
  0x39   : > { %s2692_s18 = smov 64   ;;  %s2693_s19 = smov 4  }
  0x3a   : > { %1648 = dma.hbm_to_vmem [thread:$0]  (!%p2259_p6), %s2719_s2, 3072, %s2253_s11, [#allocation6], %s2692_s18, %s2692_s18, %s2693_s19  }
  0x3b   : > { %s2721_s3 = sld [smem:[#allocation31_spill]] }
  0x41   : > { %s1855_s17 = scalar_lea.hbm %s2721_s3, 16 }
  0x42   : > { %p1856_p1 = scmp.ne.s32.totalorder %s2721_s3, %s1855_s17  ;;  %p1862_p12 = scmp.lt.u32.totalorder %s1855_s17, %s2721_s3 }
  0x44   : > { %p1858_p10 = pnand %p1856_p1, %p2275_p8 }
  0x46   : > { %p1859_p11 = pneg %p1858_p10 }
  0x48   : > { %p1864_p13 = pnand %p1862_p12, %p1859_p11 }
  0x4a   : > { %1867 = shalt.err (!%p1864_p13)
}
  0x4b   : > { %s1868_s11 = scalar_lea.vmem %s2263_s14, 16  ;;  %s1875_s27 = scalar_lea.vmem %s2263_s14, 32 }
  0x4c   : > { %p1869_p0 = scmp.ne.s32.totalorder %s2263_s14, %s1868_s11  ;;  %p1876_p7 = scmp.lt.s32.totalorder %s2263_s14, %s2263_s14 }
  0x4d   : > { %p1877_p9 = scmp.lt.s32.totalorder %s1875_s27, %s1868_s11 }
  0x4e   : > { %p1871_p3 = pnand %p1869_p0, %p2275_p8 }
  0x4f   : > { %p1878_p1 = por %p1877_p9, %p1876_p7 }
  0x50   : > { %p1872_p5 = pneg %p1871_p3 }
  0x52   : > { %p1879_p10 = pnand %p1878_p1, %p1872_p5 }
  0x54   : > { %1882 = shalt.err (!%p1879_p10)
}
  0x55   : > { %1651 = dma.hbm_to_vmem [thread:$0]  (!%p2259_p6), %s2721_s3, 16, %s2263_s14, [#allocation9]  }
  0x56   : > { %s2722_s4 = sld [smem:[#allocation32_spill]] }
  0x5c   : > { %s1883_s10 = scalar_lea.hbm %s2722_s4, 3072 }
  0x5d   : > { %p1884_p11 = scmp.ne.s32.totalorder %s2722_s4, %s1883_s10  ;;  %p1890_p0 = scmp.lt.u32.totalorder %s1883_s10, %s2722_s4 }
  0x5f   : > { %p1886_p12 = pnand %p1884_p11, %p2275_p8 }
  0x61   : > { %p1887_p13 = pneg %p1886_p12 }
  0x63   : > { %p1892_p3 = pnand %p1890_p0, %p1887_p13 }
  0x65   : > { %1895 = shalt.err (!%p1892_p3)
}
  0x66   : > { %s1896_s14 = scalar_lea.vmem %s2265_s16, 3072  ;;  %p1904_p1 = scmp.lt.s32.totalorder %s2265_s16, %s2265_s16 }
  0x67   : > { %p1897_p5 = scmp.ne.s32.totalorder %s2265_s16, %s1896_s14  ;;  %p1905_p10 = scmp.lt.s32.totalorder %s1896_s14, %s1896_s14 }
  0x69   : > { %p1899_p7 = pnand %p1897_p5, %p2275_p8  ;;  %p1906_p11 = por %p1905_p10, %p1904_p1 }
  0x6b   : > { %p1900_p9 = pneg %p1899_p7 }
  0x6d   : > { %p1907_p12 = pnand %p1906_p11, %p1900_p9 }
  0x6f   : > { %1910 = shalt.err (!%p1907_p12)
}
  0x70   : > { %1654 = dma.hbm_to_vmem [thread:$0]  (!%p2259_p6), %s2722_s4, 3072, %s2265_s16, [#allocation9], %s2692_s18, %s2692_s18, %s2693_s19  }
  0x71   : > { %s2144_s28 = smov [#allocation11]   ;;  %s2723_s5 = sld [smem:[#allocation33_spill]] }
  0x72   : > { %s264_s9 = sshll.u32 %s2144_s28, 4  ;;  %s265_s9 = int_to_ptr.vmem [resolvable:$true] %s264_s9 }
  0x77   : > { %s1911_s13 = scalar_lea.hbm %s2723_s5, 16 }
  0x78   : > { %p1912_p13 = scmp.ne.s32.totalorder %s2723_s5, %s1911_s13  ;;  %p1918_p5 = scmp.lt.u32.totalorder %s1911_s13, %s2723_s5 }
  0x7a   : > { %p1914_p0 = pnand %p1912_p13, %p2275_p8 }
  0x7c   : > { %p1915_p3 = pneg %p1914_p0 }
  0x7e   : > { %p1920_p7 = pnand %p1918_p5, %p1915_p3 }
  0x80   : > { %1923 = shalt.err (!%p1920_p7)
}
  0x81   : > { %s1924_s16 = scalar_lea.vmem %s265_s9, 16  ;;  %s1931_s27 = scalar_lea.vmem %s265_s9, 32 }
  0x82   : > { %p1925_p9 = scmp.ne.s32.totalorder %s265_s9, %s1924_s16  ;;  %p1932_p11 = scmp.lt.s32.totalorder %s265_s9, %s265_s9 }
  0x83   : > { %p1933_p12 = scmp.lt.s32.totalorder %s1931_s27, %s1924_s16 }
  0x84   : > { %p1927_p1 = pnand %p1925_p9, %p2275_p8 }
  0x85   : > { %p1934_p2 = por %p1933_p12, %p1932_p11 }
  0x86   : > { %p1928_p10 = pneg %p1927_p1 }
  0x88   : > { %p1935_p4 = pnand %p1934_p2, %p1928_p10 }
  0x8a   : > { %1938 = shalt.err (!%p1935_p4)
}
  0x8b   : > { %1657 = dma.hbm_to_vmem [thread:$0]  (!%p2259_p6), %s2723_s5, 16, %s265_s9, [#allocation12]  }
  0x8c   : > { %s1349_s6 = sadd.s32 4294967294, %s2137_s7   ;;  %p55_p2 = scmp.ne.s32.totalorder %s2117_s26, %s2113_s25 }
  0x8d   : > { %p2695_p4 = scmp.eq.s32.totalorder %s2137_s7, 0  ;;  %p61_p8 = scmp.ne.s32.totalorder %s2113_s25, %s2109_s24 }
  0x8e   : > { %p2724_p13 = scmp.eq.s32.totalorder %s2243_s8, 3  ;;  %p207_p3 = scmp.eq.s32.totalorder %s1349_s6, 3 }
  0x8f   : > { %p2382_p5 = por %p2695_p4, %p55_p2  ;;  %p2728_p7 = scmp.eq.s32.totalorder %s2243_s8, 0 }
  0x90   : > { %p2376_p0 = por %p2724_p13, %p55_p2  ;;  %p2392_p9 = por %p207_p3, %p61_p8 }
  0x91   : > { %p2388_p6 = por %p2728_p7, %p61_p8  ;;  %p2694_p1 = scmp.lt.s32.totalorder %s2137_s7, 4 }
  0x92   : > { %s2725_s20 = scalar_select %p2376_p0, 1, 0 }
  0x93   : > { %s2730_s13 = scalar_select %p2392_p9, 1, 0 }
  0x94   : > { %2726 = sst [smem:[#allocation26_spill]] %s2725_s20  ;;  %s275_s15 = sand.u32 1, %s2117_s26  }
  0x95   : > { %2731 = sst [smem:[#allocation27_spill]] %s2730_s13  ;;  %s1359_s17 = sshll.u32 %s2129_s29, 1 }
  0x96   : > { %s1358_s11 = sshll.u32 %s275_s15, 3  ;;  %s1360_s14 = sshll.u32 %s2133_s30, 2 }
  0x97   : > { %s285_s16 = sadd.s32 %s1360_s14, %s1359_s17  ;;  %s279_s27 = scalar_lea.vmem [#allocation2], %s1358_s11 }
  0x98   : > { %s288_s1 = sshll.u32 %s279_s27, 4  ;;  %s1361_s28 = sshll.u32 %s285_s16, 6  ;;  %s2400_s1 = int_to_ptr.vmem [resolvable:$true] %s288_s1 }
  0x99   : > { %s2732_s0 = sld [smem:[#allocation28_spill]]  ;;  %p2411_p10 = pnand %p2694_p1, %p2382_p5 }
  0x9a   : > { %s2415_s17 = scalar_lea.sflag [#allocation3], %s275_s15 }
  0x9b   : > { %p1941_p12 = pneg %p2411_p10 }
  0x9f   : > { %s2405_s18 = scalar_lea.hbm %s2732_s0, %s1361_s28  ;;  %s1944_s14 = scalar_lea.hbm %s2732_s0, 512 }
  0xa0   : > { %s1939_s11 = scalar_lea.hbm %s2405_s18, 128  ;;  %p1945_p13 = scmp.lt.u32.totalorder %s2405_s18, %s2732_s0 }
  0xa1   : > { %p1940_p11 = scmp.ne.s32.totalorder %s2405_s18, %s1939_s11  ;;  %p1946_p3 = scmp.lt.u32.totalorder %s1944_s14, %s1939_s11 }
  0xa2   : > { %p1948_p7 = scmp.lt.u32.totalorder %s1939_s11, %s2405_s18 }
  0xa3   : > { %p1942_p2 = pnand %p1941_p12, %p1940_p11  ;;  %p1947_p5 = por %p1946_p3, %p1945_p13 }
  0xa5   : > { %p1943_p8 = pneg %p1942_p2  ;;  %p1949_p1 = por %p1948_p7, %p1947_p5 }
  0xa7   : > { %p1950_p4 = pnand %p1949_p1, %p1943_p8 }
  0xa9   : > { %1953 = shalt.err (!%p1950_p4)
}
  0xaa   : > { %s1954_s15 = scalar_lea.vmem %s2400_s1, 128  ;;  %s2145_s28 = smov [#allocation2]  }
  0xab   : > { %p1955_p11 = scmp.ne.s32.totalorder %s2400_s1, %s1954_s15  ;;  %s1959_s6 = sshll.u32 %s2145_s28, 4  ;;  %s1960_s6 = int_to_ptr.vmem [resolvable:$false] %s1959_s6 }
  0xac   : > { %s1961_s12 = scalar_lea.vmem %s1960_s6, 256  ;;  %p1962_p0 = scmp.lt.s32.totalorder %s2400_s1, %s1960_s6 }
  0xad   : > { %p1957_p2 = pnand %p1955_p11, %p1941_p12  ;;  %p1963_p13 = scmp.lt.s32.totalorder %s1961_s12, %s1954_s15 }
  0xaf   : > { %p1958_p9 = pneg %p1957_p2  ;;  %p1964_p3 = por %p1963_p13, %p1962_p0 }
  0xb1   : > { %p1965_p5 = pnand %p1964_p3, %p1958_p9 }
  0xb3   : > { %1968 = shalt.err (!%p1965_p5)
}
  0xb4   : > { %s2734_s11 = smov 4   ;;  %s2735_s10 = smov 64  }
  0xb5   : > { %1661 = dma.hbm_to_vmem [thread:$0]  (!%p2411_p10), %s2405_s18, 128, %s2400_s1, %s2415_s17, %s2735_s10, %s2735_s10, %s2734_s11  }
  0xb6   : > { %s36_s19 = sadd.s32 1, %s2129_s29  ;;  %s39_s14 = sadd.s32 1, %s2133_s30 }
  0xb7   : > { %p37_p4 = scmp.ge.s32.totalorder %s36_s19, 2  ;;  %s1350_s16 = sshll.u32 %s2133_s30, 1 }
  0xb8   : > { %s78_s27 = sadd.s32 1, %s2105_s23  ;;  %s72_s28 = sadd.s32 %s2129_s29, %s1350_s16 }
  0xb9   : > { %s2775_s19 = smov (%p37_p4, %s36_s19), 0  ;;  %s2777_s14 = smov (!%p37_p4, %s39_s14), %s2133_s30 }
  0xba   : > { %s44_s15 = ssub.s32 %s2129_s29, %s2775_s19  ;;  %p41_p0 = scmp.ge.s32.totalorder %s2777_s14, 2 }
  0xbb   : > { %p85_p9 = scmp.ne.s32.totalorder %s2105_s23, %s2101_s22  ;;  %p91_p1 = scmp.ne.s32.totalorder %s2101_s22, %s2097_s21 }
  0xbc   : > { %s298_s18 = sand.u32 1, %s2137_s7   ;;  %s2779_s14 = smov (%p41_p0, %s2777_s14), 0 }
  0xbd   : > { %p2736_p10 = scmp.eq.s32.totalorder %s2137_s7, 0  ;;  %p2738_p8 = scmp.eq.s32.totalorder %s2243_s8, 0 }
  0xbe   : > { %s43_s6 = ssub.s32 %s2133_s30, %s2779_s14  ;;  %s1351_s12 = sshll.u32 %s2779_s14, 1 }
  0xbf   : > { %p2465_p12 = por %p85_p9, %p2736_p10  ;;  %p2471_p7 = por %p91_p1, %p2738_p8 }
  0xc0   : > { %s45_s21 = sor.u32 %s44_s15, %s43_s6  ;;  %s74_s11 = sadd.s32 %s1351_s12, %s2775_s19 }
  0xc1   : > { %s2739_s17 = scalar_select %p2471_p7, 1, 0 }
  0xc2   : > { %p46_p11 = scmp.eq.s32.totalorder %s45_s21, 0  ;;  %s75_s10 = ssub.s32 %s72_s28, %s74_s11 }
  0xc3   : > { %p76_p2 = scmp.eq.s32.totalorder %s75_s10, 0  ;;  %s2740_s16 = sadd.s32 1, %s2117_s26 }
  0xc4   : > { %s2482_s0 = scalar_select %p46_p11, %s2117_s26, %s2740_s16  }
  0xc5   : > { %s2485_s2 = scalar_select %p76_p2, %s2105_s23, %s78_s27  }
  0xc6   : > { %s300_s3 = sand.u32 1, %s2105_s23   ;;  %s1364_s4 = sshll.u32 %s72_s28, 5 }
  0xc7   : > { %s1362_s5 = sshll.u32 %s300_s3, 1  ;;  %s2741_s24 = sld [smem:[#allocation29_spill]] }
  0xc8   : > { %p2743_p13 = scmp.lt.s32.totalorder %s2137_s7, 4  ;;  %s302_s27 = scalar_lea.vmem [#allocation5], %s1362_s5 }
  0xc9   : > { %s311_s28 = sshll.u32 %s302_s27, 4  ;;  %s299_s3 = scalar_lea.sflag [#allocation6], %s298_s18  ;;  %s2501_s28 = int_to_ptr.vmem [resolvable:$true] %s311_s28 }
  0xca   : > { %p2497_p3 = pnand %p2743_p13, %p2465_p12 }
  0xcc   : > { %p1971_p4 = pneg %p2497_p3 }
  0xcd   : > { %s2742_s20 = smov %s2741_s24  ;;  %s2491_s22 = scalar_lea.hbm %s2741_s24, %s1364_s4 }
  0xce   : > { %s1969_s29 = scalar_lea.hbm %s2491_s22, 32  ;;  %s1974_s13 = scalar_lea.hbm %s2742_s20, 128 }
  0xcf   : > { %p1970_p5 = scmp.ne.s32.totalorder %s2491_s22, %s1969_s29  ;;  %p1975_p1 = scmp.lt.u32.totalorder %s2491_s22, %s2742_s20 }
  0xd0   : > { %p1976_p10 = scmp.lt.u32.totalorder %s1974_s13, %s1969_s29  ;;  %p1978_p8 = scmp.lt.u32.totalorder %s1969_s29, %s2491_s22 }
  0xd1   : > { %p1972_p0 = pnand %p1971_p4, %p1970_p5 }
  0xd2   : > { %p1977_p12 = por %p1976_p10, %p1975_p1 }
  0xd3   : > { %p1973_p9 = pneg %p1972_p0 }
  0xd4   : > { %p1979_p11 = por %p1978_p8, %p1977_p12 }
  0xd6   : > { %p1980_p2 = pnand %p1979_p11, %p1973_p9 }
  0xd8   : > { %1983 = shalt.err (!%p1980_p2)
}
  0xd9   : > { %s1984_s5 = scalar_lea.vmem %s2501_s28, 32  ;;  %s2146_s18 = smov [#allocation5]  }
  0xda   : > { %p1985_p13 = scmp.ne.s32.totalorder %s2501_s28, %s1984_s5  ;;  %s1989_s12 = sshll.u32 %s2146_s18, 4  ;;  %s1990_s12 = int_to_ptr.vmem [resolvable:$false] %s1989_s12 }
  0xdb   : > { %s1991_s21 = scalar_lea.vmem %s1990_s12, 64  ;;  %p1992_p7 = scmp.lt.s32.totalorder %s2501_s28, %s1990_s12 }
  0xdc   : > { %p1987_p5 = pnand %p1985_p13, %p1971_p4  ;;  %p1993_p1 = scmp.lt.s32.totalorder %s1991_s21, %s1984_s5 }
  0xde   : > { %p1988_p0 = pneg %p1987_p5  ;;  %p1994_p10 = por %p1993_p1, %p1992_p7 }
  0xe0   : > { %p1995_p12 = pnand %p1994_p10, %p1988_p0 }
  0xe2   : > { %1998 = shalt.err (!%p1995_p12)
}
  0xe3   : > { %1664 = dma.hbm_to_vmem [thread:$0]  (!%p2497_p3), %s2491_s22, 32, %s2501_s28, %s299_s3  }
  0xe4   : > { %s2745_s11 = sld [smem:[#allocation25_spill]] }
  0xea   : > { %p2746_p9 = scmp.ne.s32.totalorder %s2745_s11, 0 }
  0xeb   : > { %s2531_s10 = sand.u32 (!%p2746_p9), 1, %s2113_s25  }
  0xec   : > { %320 = sbr.rel (%p2746_p9) target bundleno = 830 (0x33e), region = 44  ;;  %s1366_s16 = sshll.u32 (!%p2746_p9), %s2531_s10, 3 }
  0xed   : > { %s323_s27 = scalar_lea.sflag (!%p2746_p9), [#allocation3], %s2531_s10  ;;  %s2537_s29 = scalar_lea.vmem (!%p2746_p9), [#allocation2], %s1366_s16 }
  0xf3   : > { %2072 = dma.done.wait (%p2388_p6), %s323_s27, 128  }
  0xf4   : > { %2074 = vsyncadd (%p2388_p6), %s323_s27, 4294967168  ;;  %s2747_s22 = sld [smem:[#allocation20_spill]]  ;;  %s331_s15 = sand.u32 1, %s2243_s8  }
  0xf5   : > { %s332_s4 = scalar_lea.sflag [#allocation6], %s331_s15  ;;  %p2748_p7 = scmp.ne.s32.totalorder %s2739_s17, 0 }
  0xfa   : > { %s333_s28 = sand.u32 1, %s2747_s22  }
  0xfb   : > { %s2545_s3 = sshll.u32 %s333_s28, 1 }
  0xfc   : > { %s335_s24 = scalar_lea.vmem [#allocation5], %s2545_s3 }
  0xfd   : > { %2076 = dma.done.wait (%p2748_p7), %s332_s4, 32  }
  0xfe   : > { %2078 = vsyncadd (%p2748_p7), %s332_s4, 4294967264  ;;  %p2749_p3 = scmp.eq.s32.totalorder %s2243_s8, 0 }
 0x100   : > { %2080 = dma.done.wait (%p2749_p3), [#allocation6], 3072   ;;  %p2750_p6 = pmov %p2749_p3 }
 0x101   : > { %p2751_p4 = pmov %p2749_p3 }
 0x102   : > { %2082 = vsyncadd (%p2750_p6), [#allocation6], 4294964224 }
 0x103   : > { %2084 = dma.done.wait (%p2751_p4), [#allocation9], 3088   ;;  %p2752_p8 = pmov %p2749_p3 }
 0x104   : > { %p2753_p11 = pmov %p2749_p3 }
 0x105   : > { %2086 = vsyncadd (%p2752_p8), [#allocation9], 4294964208 }
 0x106   : > { %2088 = dma.done.wait (%p2753_p11), [#allocation12], 16   ;;  %p2754_p2 = pmov %p2749_p3 }
 0x107   : > { %v1777_v0 = vld [vmem:[#allocation7 + $0x40] sm:$0xff]   ;;  %v1779_v2 = vld [vmem:[#allocation7 + $0x48] sm:$0xff]   ;;  %v1781_v4 = vld [vmem:[#allocation7 + $0x50] sm:$0xff]   ;;  %vm399_vm0 = vcmask 1040384   ;;  %vm439_vm1 = vsmask.f32 7424 }
 0x108   : > { %2090 = vsyncadd (%p2754_p2), [#allocation12], 4294967280  ;;  %v1778_v1 = vld [vmem:[#allocation7] sm:$0xff]   ;;  %1503 = vmatprep.subr.bf16.mxu0 %v1777_v0  ;;  %v1780_v3 = vld [vmem:[#allocation7 + $0x8] sm:$0xff]   ;;  %vm666_vm2 = vcmask 1046528   ;;  %v2147_v43 = vmov 0.0  }
 0x109   : > { %1523 = vmatprep.subr.bf16.mxu1 %v1778_v1  ;;  %1504 = vmatpush3.bf16.msra.mxu0 %v1777_v0  ;;  %v1782_v5 = vld [vmem:[#allocation7 + $0x10] sm:$0xff]   ;;  %v1783_v6 = vld [vmem:[#allocation7 + $0x58] sm:$0xff]   ;;  %v1785_v8 = vld [vmem:[#allocation7 + $0x60] sm:$0xff]   ;;  %vm2148_vm3 = vmmov 0   ;;  %s2755_s8 = sld [smem:[#allocation22_spill]]  ;;  %s2756_s17 = sld [smem:[#allocation23_spill]] }
 0x10a   : > { %1524 = vmatpush3.bf16.msra.mxu1 %v1778_v1  ;;  %1505 = vmatprep.subr.bf16.mxu0 %v1779_v2  ;;  %v1784_v7 = vld [vmem:[#allocation7 + $0x18] sm:$0xff]   ;;  %v1786_v9 = vld [vmem:[#allocation7 + $0x20] sm:$0xff]   ;;  %v1787_v10 = vld [vmem:[#allocation7 + $0x68] sm:$0xff]   ;;  %s2757_s5 = sld [smem:[#allocation26_spill]]  ;;  %s384_s12 = scalar_lea.vmem [#allocation13], %s1366_s16 }
 0x10b   : > { %1525 = vmatprep.subr.bf16.mxu1 %v1780_v3  ;;  %v2565_v11 = vld [vmem:[%s2537_s29] sm:$0xff]   ;;  %v392_v13 = vld [vmem:[%s335_s24] sm:$0x3]  ;;  %v1794_v30 = vld [vmem:[#allocation7 + $0x80] sm:$0xff]   ;;  %s1195_s21 = sshll.u32 %s384_s12, 4  ;;  %s2758_s29 = sld [smem:[#allocation34_spill]]  ;;  %s2616_s21 = int_to_ptr.vmem [resolvable:$true] %s1195_s21 }
 0x10c   : > { %v1788_v12 = vld [vmem:[#allocation7 + $0x28] sm:$0xff]   ;;  %v398_v14 = vrot.slane %v2565_v11, 7  ;;  %v1789_v15 = vld [vmem:[#allocation7 + $0x70] sm:$0xff]   ;;  %v1791_v22 = vld [vmem:[#allocation7 + $0x78] sm:$0xff]   ;;  %s1180_s28 = scalar_lea.sflag [#allocation4], %s2531_s10  ;;  %s1999_s3 = scalar_lea.vmem %s2616_s21, 128 }
 0x10d   : > { %1506 = vmatpush3.bf16.msra.mxu0 %v1779_v2  ;;  %v1790_v16 = vld [vmem:[#allocation7 + $0x30] sm:$0xff]   ;;  %v1792_v23 = vld [vmem:[#allocation7 + $0x38] sm:$0xff]   ;;  %v1795_v33 = vld [vmem:[#allocation7 + $0x88] sm:$0xff]   ;;  %p2000_p13 = scmp.ne.s32.totalorder %s2616_s21, %s1999_s3  ;;  %s2149_s16 = smov [#allocation13]  }
 0x10e   : > { %1526 = vmatpush3.bf16.msra.mxu1 %v1780_v3  ;;  %1507 = vmatprep.subr.bf16.mxu0 %v1781_v4  ;;  %v402_v17 = vsel %vm399_vm0, %v392_v13, %v398_v14  ;;  %v404_v18 = vsel %vm399_vm0, %v398_v14, %v392_v13  ;;  %v1796_v35 = vld [vmem:[#allocation7 + $0x90] sm:$0xff]   ;;  %v1797_v36 = vld [vmem:[#allocation7 + $0x98] sm:$0xff]   ;;  %v1798_v37 = vld [vmem:[#allocation7 + $0xa0] sm:$0xff]   ;;  %s2003_s4 = sshll.u32 %s2149_s16, 4  ;;  %s2004_s4 = int_to_ptr.vmem [resolvable:$false] %s2003_s4 }
 0x10f   : > { %1527 = vmatprep.subr.bf16.mxu1 %v1782_v5  ;;  %v440_v19 = vshrl.u32 %v402_v17, 16  ;;  %v442_v20 = vshll.u32 %v402_v17, 16  ;;  %v446_v21 = vshll.u32 %v404_v18, 16  ;;  %1539 = vmatprep.mubr.bf16.mxu1 %v402_v17  ;;  %v450_v26 = vshrl.u32 %v404_v18, 16  ;;  %v1799_v38 = vld [vmem:[#allocation7 + $0xa8] sm:$0xff]   ;;  %v1800_v39 = vld [vmem:[#allocation7 + $0xb0] sm:$0xff]   ;;  %p2006_p10 = scmp.lt.s32.totalorder %s2616_s21, %s2004_s4 }
 0x110   : > { %v667_v27 = vrot.slane %v402_v17, 1  ;;  %v668_v28 = vrot.slane %v404_v18, 1  ;;  %v1801_v40 = vld [vmem:[#allocation7 + $0xb8] sm:$0xff]   ;;  %v1802_v41 = vld [vmem:[#allocation10] sm:$0xff]   ;;  %v1803_v44 = vld [vmem:[#allocation10 + $0x8] sm:$0xff]   ;;  %s1399_s9 = sshll.u32 %s2755_s8, 4 }
 0x111   : > { %1508 = vmatpush3.bf16.msra.mxu0 %v1781_v4  ;;  %v444_v24 = vrot.slane %v442_v20, 1  ;;  %v448_v25 = vrot.slane %v446_v21, 1  ;;  %v1804_v42 = vld [vmem:[#allocation10 + $0x40] sm:$0xff]   ;;  %v1806_v45 = vld [vmem:[#allocation10 + $0x48] sm:$0xff]   ;;  %v1805_v46 = vld [vmem:[#allocation10 + $0x10] sm:$0xff]   ;;  %s1434_s13 = sshll.u32 %s2755_s8, 1  ;;  %s2759_s15 = smov %s2758_s29 }
 0x112   : > { %1528 = vmatpush3.bf16.msra.mxu1 %v1782_v5  ;;  %1509 = vmatprep.subr.bf16.mxu0 %v1783_v6  ;;  %v669_v34 = vsel %vm666_vm2, %v667_v27, %v668_v28  ;;  %v1808_v47 = vld [vmem:[#allocation10 + $0x50] sm:$0xff]   ;;  %v1807_v48 = vld [vmem:[#allocation10 + $0x18] sm:$0xff]   ;;  %v1809_v49 = vld [vmem:[#allocation10 + $0x20] sm:$0xff]   ;;  %v785_v5 = vlaneseq  ;;  %s1435_s1 = sshll.u32 %s2756_s17, 2  ;;  %p2760_p5 = scmp.ne.s32.totalorder %s2757_s5, 0 }
 0x113   : > { %1529 = vmatprep.subr.bf16.mxu1 %v1784_v7  ;;  %v445_v29 = vor.u32 %v444_v24, %v440_v19  ;;  %v452_v32 = vor.u32 %v450_v26, %v448_v25  ;;  %v1810_v50 = vld [vmem:[#allocation10 + $0x58] sm:$0xff]   ;;  %v1811_v51 = vld [vmem:[#allocation10 + $0x28] sm:$0xff]   ;;  %v1812_v52 = vld [vmem:[#allocation10 + $0x60] sm:$0xff]   ;;  %s1192_s6 = sadd.s32 %s1435_s1, %s1434_s13  ;;  %s2005_s24 = scalar_lea.vmem %s2004_s4, 256 }
 0x114   : > { %v1813_v53 = vld [vmem:[#allocation10 + $0x30] sm:$0xff]   ;;  %v1814_v54 = vld [vmem:[#allocation10 + $0x68] sm:$0xff]   ;;  %v1815_v55 = vld [vmem:[#allocation10 + $0x38] sm:$0xff]   ;;  %s1436_s18 = sshll.u32 %s1192_s6, 6  ;;  %p2001_p0 = pnand %p2000_p13, %p2760_p5 }
 0x115   : > { %1510 = vmatpush3.bf16.msra.mxu0 %v1783_v6  ;;  %v449_v31 = vsel %vm439_vm1, %v445_v29, %v448_v25  ;;  %v1816_v56 = vld [vmem:[#allocation10 + $0x70] sm:$0xff]   ;;  %v1817_v57 = vld [vmem:[#allocation10 + $0x78] sm:$0xff]   ;;  %v786_v6 = vshrl.u32 %v785_v5, 7  ;;  %s2614_s22 = scalar_lea.hbm %s2758_s29, %s1436_s18  ;;  %p2007_p12 = scmp.lt.s32.totalorder %s2005_s24, %s1999_s3 }
 0x116   : > { %1530 = vmatpush3.bf16.msra.mxu1 %v1784_v7  ;;  %1511 = vmatprep.subr.bf16.mxu0 %v1785_v8  ;;  %v1398_v17 = vld [vmem:[#allocation8] ss:$0 sm:$0xff]  ;;  %p2002_p1 = pneg %p2001_p0 }
 0x117   : > { %1531 = vmatprep.subr.bf16.mxu1 %v1786_v9  ;;  %1519 = vmatprep.mubr.bf16.mxu0 %v449_v31  ;;  %v788_v7 = vadd.s32 16, %v786_v6  ;;  %p2008_p9 = por %p2007_p12, %p2006_p10 }
 0x119   : > { %1512 = vmatpush3.bf16.msra.mxu0 %v1785_v8  ;;  %v789_v8 = vstv %s1399_s9  ;;  %p2009_p7 = pnand %p2008_p9, %p2002_p1 }
 0x11a   : > { %1532 = vmatpush3.bf16.msra.mxu1 %v1786_v9  ;;  %1513 = vmatprep.subr.bf16.mxu0 %v1787_v10  ;;  %v787_v9 = vadd.s32 8, %v786_v6  ;;  %v790_v13 = vadd.s32 %v789_v8, %v786_v6 }
 0x11b   : > { %1533 = vmatprep.subr.bf16.mxu1 %v1788_v12 }
 0x11d   : > { %1514 = vmatpush3.bf16.msra.mxu0 %v1787_v10  ;;  %v792_v10 = vadd.s32 %v789_v8, %v788_v7 }
 0x11e   : > { %1534 = vmatpush3.bf16.msra.mxu1 %v1788_v12  ;;  %1515 = vmatprep.subr.bf16.mxu0 %v1789_v15  ;;  %v791_v12 = vadd.s32 %v789_v8, %v787_v9  ;;  %v1164_v9 = vunpack.c.h.bf16 %v2565_v11 }
 0x11f   : > { %1535 = vmatprep.subr.bf16.mxu1 %v1790_v16  ;;  %v1402_v14 = vadd.s32 4294967295, %v792_v10 }
 0x121   : > { %1516 = vmatpush3.bf16.msra.mxu0 %v1789_v15  ;;  %v1401_v15 = vadd.s32 4294967295, %v791_v12  ;;  %vm798_vm4 = vcmp.ge.s32.totalorder %v1402_v14, 0  ;;  %vm801_vm5 = vcmp.lt.s32.totalorder %v1402_v14, 32 }
 0x122   : > { %1536 = vmatpush3.bf16.msra.mxu1 %v1790_v16  ;;  %1517 = vmatprep.subr.bf16.mxu0 %v1791_v22  ;;  %vm804_vm8 = vmand %vm798_vm4, %vm801_vm5 }
 0x123   : > { %1537 = vmatprep.subr.bf16.mxu1 %v1792_v23  ;;  %vm797_vm6 = vcmp.ge.s32.totalorder %v1401_v15, 0  ;;  %vm800_vm7 = vcmp.lt.s32.totalorder %v1401_v15, 32 }
 0x124   : > { %vm803_vm11 = vmand %vm797_vm6, %vm800_vm7 }
 0x125   : > { %1518 = vmatpush3.bf16.msra.mxu0 %v1791_v22 }
 0x126   : > { %1538 = vmatpush3.bf16.msra.mxu1 %v1792_v23  ;;  %1543 = vmatprep.subr.bf16.mxu0 %v1794_v30 }
 0x127   : > { %1563 = vmatprep.subr.bf16.mxu1 %v2147_v43 }
 0x128   : > { %1520 = vmatmul.mubr.bf16.vlgmr.msra.gmra.mrb[0].mxu0 %v452_v32 }
 0x129   : > { %1540 = vmatmul.mubr.bf16.vlgmr.msra.gmra.mrb[0].mxu1 %v404_v18  ;;  %1544 = vmatpush3.bf16.msra.mxu0 %v1794_v30  ;;  %v1400_v18 = vadd.s32 4294967295, %v790_v13 }
 0x12a   : > { %1545 = vmatprep.subr.bf16.mxu0 %v1795_v33  ;;  %1559 = vmatprep.mubr.bf16.mxu0 %v669_v34 }
 0x12b   : > { %1564 = vmatpush3.bf16.msra.mxu1 %v1804_v42  ;;  %1579 = vmatprep.mubr.msk.bf16.mxu1 %vm2148_vm3, %v2147_v43  ;;  %vm796_vm9 = vcmp.ge.s32.totalorder %v1400_v18, 0  ;;  %vm799_vm10 = vcmp.lt.s32.totalorder %v1400_v18, 32 }
 0x12c   : > { %1565 = vmatprep.subr.bf16.mxu1 %v2147_v43  ;;  %vm802_vm12 = vmand %vm796_vm9, %vm799_vm10 }
 0x12d   : > { %1546 = vmatpush3.bf16.msra.mxu0 %v1795_v33  ;;  %vm1419_vm13 = vmpackc.low %vm803_vm11, %vm802_vm12 }
 0x12e   : > { %1547 = vmatprep.subr.bf16.mxu0 %v1796_v35 }
 0x12f   : > { %1566 = vmatpush3.bf16.msra.mxu1 %v1806_v45 }
 0x130   : > { %1567 = vmatprep.subr.bf16.mxu1 %v2147_v43 }
 0x131   : > { %1548 = vmatpush3.bf16.msra.mxu0 %v1796_v35 }
 0x132   : > { %1549 = vmatprep.subr.bf16.mxu0 %v1797_v36 }
 0x133   : > { %1568 = vmatpush3.bf16.msra.mxu1 %v1808_v47  ;;  %v1818_v47 = vld [vmem:[#allocation10 + $0x80] sm:$0xff]  }
 0x134   : > { %1569 = vmatprep.subr.bf16.mxu1 %v2147_v43 }
 0x135   : > { %1550 = vmatpush3.bf16.msra.mxu0 %v1797_v36 }
 0x136   : > { %1551 = vmatprep.subr.bf16.mxu0 %v1798_v37 }
 0x137   : > { %1570 = vmatpush3.bf16.msra.mxu1 %v1810_v50  ;;  %v1820_v50 = vld [vmem:[#allocation10 + $0x90] sm:$0xff]  }
 0x138   : > { %1571 = vmatprep.subr.bf16.mxu1 %v2147_v43 }
 0x139   : > { %1552 = vmatpush3.bf16.msra.mxu0 %v1798_v37 }
 0x13a   : > { %1553 = vmatprep.subr.bf16.mxu0 %v1799_v38 }
 0x13b   : > { %1572 = vmatpush3.bf16.msra.mxu1 %v1812_v52  ;;  %v1822_v52 = vld [vmem:[#allocation10 + $0xa0] sm:$0xff]  }
 0x13c   : > { %1573 = vmatprep.subr.bf16.mxu1 %v2147_v43 }
 0x13d   : > { %1554 = vmatpush3.bf16.msra.mxu0 %v1799_v38 }
 0x13e   : > { %1555 = vmatprep.subr.bf16.mxu0 %v1800_v39 }
 0x13f   : > { %1574 = vmatpush3.bf16.msra.mxu1 %v1814_v54  ;;  %v1824_v54 = vld [vmem:[#allocation10 + $0xb0] sm:$0xff]  }
 0x140   : > { %1575 = vmatprep.subr.bf16.mxu1 %v2147_v43 }
 0x141   : > { %1556 = vmatpush3.bf16.msra.mxu0 %v1800_v39 }
 0x142   : > { %1557 = vmatprep.subr.bf16.mxu0 %v1801_v40 }
 0x143   : > { %1576 = vmatpush3.bf16.msra.mxu1 %v1816_v56 }
 0x144   : > { %1577 = vmatprep.subr.bf16.mxu1 %v2147_v43 }
 0x145   : > { %1558 = vmatpush3.bf16.msra.mxu0 %v1801_v40 }
 0x146   : > { %1583 = vmatprep.subr.bf16.mxu0 %v2147_v43 }
 0x147   : > { %1578 = vmatpush3.bf16.msra.mxu1 %v1817_v57 }
 0x148   : > { %1560 = vmatmul.mubr.bf16.vlgmr.msra.gmra.mrb[4].mxu0 %v668_v28  ;;  %1603 = vmatprep.subr.bf16.mxu1 %v2147_v43 }
 0x149   : > { %1584 = vmatpush3.bf16.msra.mxu0 %v1802_v41  ;;  %1599 = vmatprep.mubr.msk.bf16.mxu0 %vm2148_vm3, %v2147_v43 }
 0x14a   : > { %1585 = vmatprep.subr.bf16.mxu0 %v2147_v43 }
 0x14d   : > { %1586 = vmatpush3.bf16.msra.mxu0 %v1803_v44 }
 0x14e   : > { %1587 = vmatprep.subr.bf16.mxu0 %v2147_v43 }
 0x151   : > { %1588 = vmatpush3.bf16.msra.mxu0 %v1805_v46 }
 0x152   : > { %1589 = vmatprep.subr.bf16.mxu0 %v2147_v43 }
 0x155   : > { %1590 = vmatpush3.bf16.msra.mxu0 %v1807_v48 }
 0x156   : > { %1591 = vmatprep.subr.bf16.mxu0 %v2147_v43 }
 0x159   : > { %1592 = vmatpush3.bf16.msra.mxu0 %v1809_v49  ;;  %v1819_v49 = vld [vmem:[#allocation10 + $0x88] sm:$0xff]  }
 0x15a   : > { %1593 = vmatprep.subr.bf16.mxu0 %v2147_v43 }
 0x15d   : > { %1594 = vmatpush3.bf16.msra.mxu0 %v1811_v51  ;;  %v1821_v51 = vld [vmem:[#allocation10 + $0x98] sm:$0xff]  }
 0x15e   : > { %1595 = vmatprep.subr.bf16.mxu0 %v2147_v43 }
 0x161   : > { %1596 = vmatpush3.bf16.msra.mxu0 %v1813_v53  ;;  %v1823_v53 = vld [vmem:[#allocation10 + $0xa8] sm:$0xff]  }
 0x162   : > { %1597 = vmatprep.subr.bf16.mxu0 %v2147_v43 }
 0x165   : > { %1598 = vmatpush3.bf16.msra.mxu0 %v1815_v55  ;;  %v1825_v55 = vld [vmem:[#allocation10 + $0xb8] sm:$0xff]  }
 0x1fb   : > { %v1521_v58 = vpop.f32.mrb[0].mxu0 }
 0x1fc   : > { %v1541_v59 = vpop.f32.mrb[0].mxu1  ;;  %v537_v60 = vpop.f32.mrb[1].mxu0 }
 0x1fd   : > { %v642_v61 = vadd.f32 %v1541_v59, %v1521_v58  ;;  %v633_v62 = vpop.f32.mrb[1].mxu1  ;;  %v1522_v63 = vpop.f32.mrb[2].mxu0 }
 0x1fe   : > { %v634_v0 = vadd.f32 %v633_v62, %v537_v60  ;;  %v1542_v1 = vpop.f32.mrb[2].mxu1  ;;  %v540_v2 = vpop.f32.mrb[3].mxu0 }
 0x1ff   : > { %v636_v3 = vpop.f32.mrb[3].mxu1 }
 0x200   : > { %v637_v4 = vadd.f32 %v636_v3, %v540_v2  ;;  %v1430_v3 = vld [vmem:[#allocation11] ss:$0 sm:$0xff] }
 0x21b   : > { %v1561_v16 = vpop.f32.mrb[4].mxu0 }
 0x21c   : > { %v770_v19 = vadd.f32 %v1561_v16, %v642_v61  ;;  %v754_v20 = vpop.f32.mrb[5].mxu0 }
 0x21d   : > { %v768_v21 = vadd.f32 %v754_v20, %v634_v0  ;;  %v1562_v22 = vpop.f32.mrb[6].mxu0 }
 0x21e   : > { %v780_v23 = vadd.f32 %v1398_v17, %v770_v19  ;;  %v757_v24 = vpop.f32.mrb[7].mxu0 }
 0x21f   : > { %v778_v25 = vadd.f32 %v1398_v17, %v768_v21  ;;  %v769_v26 = vadd.f32 %v757_v24, %v637_v4 }
 0x220   : > { %v783_v27 = vmax.f32 %v780_v23, 0.0 }
 0x221   : > { %v781_v28 = vmax.f32 %v778_v25, 0.0  ;;  %v779_v29 = vadd.f32 %v1398_v17, %v769_v26 }
 0x222   : > { %v813_v30 = vsel %vm804_vm8, %v783_v27, 0.0 }
 0x223   : > { %v782_v31 = vmax.f32 %v779_v29, 0.0  ;;  %v815_v32 = vpack.c.bf16 %v813_v30, %v813_v30  ;;  %v811_v33 = vsel %vm802_vm12, %v781_v28, 0.0 }
 0x225   : > { %v812_v34 = vsel %vm803_vm11, %v782_v31, 0.0  ;;  %v1420_v35 = vpack.c.bf16 %v782_v31, %v781_v28  ;;  %v857_v37 = vshll.u32 %v815_v32, 16  ;;  %v1060_v38 = vrot.slane %v815_v32, 1 }
 0x226   : > { %v814_v36 = vpack.c.bf16 %v812_v34, %v811_v33 }
 0x227   : > { %1600 = vmatmul.mubr.msk.bf16.vlgmr.msra.gmra.mrb[8].mxu0 %vm1419_vm13, %v1420_v35  ;;  %v859_v45 = vrot.slane %v857_v37, 1 }
 0x228   : > { %v852_v39 = vshll.u32 %v814_v36, 16  ;;  %v1059_v40 = vrot.slane %v814_v36, 1  ;;  %v850_v41 = vshrl.u32 %v814_v36, 16 }
 0x22a   : > { %v854_v42 = vrot.slane %v852_v39, 1  ;;  %v1061_v44 = vsel %vm666_vm2, %v1059_v40, %v1060_v38 }
 0x22c   : > { %v855_v46 = vor.u32 %v854_v42, %v850_v41 }
 0x22e   : > { %v860_v48 = vsel %vm439_vm1, %v855_v46, %v859_v45 }
 0x22f   : > { %1580 = vmatmul.mubr.bf16.vlgmr.msra.gmra.mrb[4].mxu1 %v860_v48 }
 0x230   : > { %1604 = vmatpush3.bf16.msra.mxu1 %v1818_v47  ;;  %1619 = vmatprep.mubr.msk.bf16.mxu1 %vm2148_vm3, %v2147_v43 }
 0x231   : > { %1605 = vmatprep.subr.bf16.mxu1 %v2147_v43 }
 0x234   : > { %1606 = vmatpush3.bf16.msra.mxu1 %v1819_v49 }
 0x235   : > { %1607 = vmatprep.subr.bf16.mxu1 %v2147_v43 }
 0x238   : > { %1608 = vmatpush3.bf16.msra.mxu1 %v1820_v50 }
 0x239   : > { %1609 = vmatprep.subr.bf16.mxu1 %v2147_v43 }
 0x23c   : > { %1610 = vmatpush3.bf16.msra.mxu1 %v1821_v51 }
 0x23d   : > { %1611 = vmatprep.subr.bf16.mxu1 %v2147_v43 }
 0x240   : > { %1612 = vmatpush3.bf16.msra.mxu1 %v1822_v52 }
 0x241   : > { %1613 = vmatprep.subr.bf16.mxu1 %v2147_v43 }
 0x244   : > { %1614 = vmatpush3.bf16.msra.mxu1 %v1823_v53 }
 0x245   : > { %1615 = vmatprep.subr.bf16.mxu1 %v2147_v43 }
 0x248   : > { %1616 = vmatpush3.bf16.msra.mxu1 %v1824_v54 }
 0x249   : > { %1617 = vmatprep.subr.bf16.mxu1 %v2147_v43  ;;  %v1163_v43 = vunpack.c.l.bf16 %v2565_v11 }
 0x24c   : > { %1618 = vmatpush3.bf16.msra.mxu1 %v1825_v55 }
 0x24f   : > { %1620 = vmatmul.mubr.bf16.vlgmr.msra.gmra.mrb[8].mxu1 %v1061_v44 }
 0x2fa   : > { %v1033_v56 = vpop.f32.mrb[8].mxu0 }
 0x2fb   : > { %v1601_v57 = vpop.f32.mrb[9].mxu0 }
 0x2fc   : > { %v1036_v58 = vpop.f32.mrb[10].mxu0 }
 0x2fd   : > { %v1602_v59 = vpop.f32.mrb[11].mxu0 }
 0x302   : > { %v944_v60 = vpop.f32.mrb[4].mxu1 }
 0x303   : > { %v1034_v61 = vadd.f32 %v1033_v56, %v944_v60  ;;  %v1581_v62 = vpop.f32.mrb[5].mxu1 }
 0x304   : > { %v947_v63 = vpop.f32.mrb[6].mxu1 }
 0x305   : > { %v1037_v0 = vadd.f32 %v1036_v58, %v947_v63  ;;  %v1582_v1 = vpop.f32.mrb[7].mxu1 }
 0x322   : > { %v1145_v2 = vpop.f32.mrb[8].mxu1 }
 0x323   : > { %v1152_v4 = vadd.f32 %v1145_v2, %v1034_v61  ;;  %v1621_v5 = vpop.f32.mrb[9].mxu1 }
 0x324   : > { %v1148_v6 = vpop.f32.mrb[10].mxu1 }
 0x325   : > { %v1161_v7 = vadd.f32 %v1430_v3, %v1152_v4  ;;  %v1153_v8 = vadd.f32 %v1148_v6, %v1037_v0  ;;  %v1622_v10 = vpop.f32.mrb[11].mxu1 }
 0x327   : > { %v1165_v12 = vadd.f32 %v1163_v43, %v1161_v7  ;;  %v1162_v13 = vadd.f32 %v1430_v3, %v1153_v8 }
 0x329   : > { %v1166_v14 = vadd.f32 %v1164_v9, %v1162_v13  ;;  %v1167_v15 = vmax.f32 %v1165_v12, 0.0 }
 0x32b   : > { %v1168_v16 = vmax.f32 %v1166_v14, 0.0 }
 0x32d   : > { %v1444_v11 = vpack.c.bf16 %v1168_v16, %v1167_v15 }
 0x32f   : > { %1445 = vst [vmem:[%s384_s12] sm:$0xff] %v1444_v11  }
 0x330   : > { %2012 = shalt.err (!%p2009_p7)
}
 0x331   : > { %s2013_s8 = scalar_lea.hbm %s2614_s22, 128  ;;  %s2017_s13 = scalar_lea.hbm %s2759_s15, 512 }
 0x332   : > { %p2014_p3 = scmp.ne.s32.totalorder %s2614_s22, %s2013_s8  ;;  %p2018_p8 = scmp.lt.u32.totalorder %s2614_s22, %s2759_s15 }
 0x333   : > { %p2019_p11 = scmp.lt.u32.totalorder %s2017_s13, %s2013_s8  ;;  %p2021_p13 = scmp.lt.u32.totalorder %s2013_s8, %s2614_s22 }
 0x334   : > { %p2015_p6 = pnand %p2014_p3, %p2760_p5 }
 0x335   : > { %p2020_p2 = por %p2019_p11, %p2018_p8 }
 0x336   : > { %p2016_p4 = pneg %p2015_p6 }
 0x337   : > { %p2022_p0 = por %p2021_p13, %p2020_p2 }
 0x339   : > { %p2023_p1 = pnand %p2022_p0, %p2016_p4 }
 0x33b   : > { %2026 = shalt.err (!%p2023_p1)
}
 0x33c   : > { %s2150_s18 = smov 64   ;;  %s2151_s12 = smov 4  }
 0x33d   : > { %1643 = dma.vmem_to_hbm [thread:$0]  (%p2760_p5), %s2616_s21, 128, %s2614_s22, %s1180_s28, %s2150_s18, %s2150_s18, %s2151_s12  }
 0x33e PF: > { %s2761_s11 = sld [smem:[#allocation21_spill]]  ;;  %s2762_s27 = sld [smem:[#allocation27_spill]] }
 0x33f   : > { %p1678_p10 = scmp.ge.s32.totalorder %s2137_s7, 2 }
 0x344   : > { %s1210_s29 = sand.u32 1, %s2761_s11   ;;  %p2763_p12 = scmp.ne.s32.totalorder %s2762_s27, 0 }
 0x345   : > { %s1211_s3 = scalar_lea.sflag [#allocation4], %s1210_s29 }
 0x346   : > { %p1666_p9 = pnand %p1678_p10, %p2763_p12 }
 0x348   : > { %2092 = dma.done.wait (!%p1666_p9), %s1211_s3, 128  }
 0x349   : > { %2094 = vsyncadd (!%p1666_p9), %s1211_s3, 4294967168  ;;  %s27_s7 = sadd.s32 1, %s2137_s7   ;;  %s2764_s21 = sld [smem:[#allocation20_spill]] }
 0x34a   : > { %p24_p7 = scmp.ge.s32.totalorder %s27_s7, 6   ;;  %s2765_s27 = sld [smem:[#allocation24_spill]] }
 0x34b   : > { %s2766_s22 = smov %s2105_s23  ;;  %s2767_s23 = smov %s2485_s2 }
 0x34c   : > { %s2768_s24 = smov %s2113_s25  ;;  %s2769_s25 = smov %s2117_s26 }
 0x34d   : > { %s2770_s26 = smov %s2482_s0  ;;  %s2771_s28 = smov %s2133_s30 }
 0x34e   : > { %s2772_s29 = smov %s2775_s19  ;;  %s2773_s30 = smov %s2779_s14 }
 0x34f   :  { %26 = sbr.rel (!%p24_p7) target bundleno = 21 (0x15), region = 122 }
 0x356   :  { %1216 = vsyncpa [#allocation3], 1 }
 0x357   :  { %1218 = vsyncpa [#allocation3 + $0x1], 1 }
 0x358   :  { %1219 = vsyncpa [#allocation6], 1 }
 0x359   :  { %1221 = vsyncpa [#allocation6 + $0x1], 1 }
 0x35a   :  { %1222 = vsyncpa [#allocation9], 1 }
 0x35b   :  { %1223 = vsyncpa [#allocation12], 1 }
 0x35c   :  { %1224 = vsyncpa [#allocation4], 1 }
 0x35d   :  { %1226 = vsyncpa [#allocation4 + $0x1], 1 }

</bundles_post_ra>
